<compile_context>
chip_gen: v7x
topology: tpu7x:2x2x1
jax: 0.10.0
libtpu: 0.0.40
codegen_flags: <defaults>
</compile_context>

<pallas_src>
import jax
import jax.numpy as jnp
from jax import lax
from jax.experimental import pallas as pl
from jax.experimental.pallas import tpu as pltpu


def _round_up(a, m):
    return (a + m - 1) // m * m


def _buf_bytes(rows, cols, itemsize, nbuf=1):
    """VMEM bytes for nbuf copies of a (rows, cols) buffer, padded to native tiles."""
    sub = 16 if itemsize == 2 else 8
    return nbuf * _round_up(max(rows, 1), sub) * _round_up(max(cols, 1), 128) * itemsize


# ------------------------- Pallas kernels -------------------------

def conv_stats_kernel(p_ref, w_ref, y_ref, stats_ref, acc_ref):
    """One (M-tile, K-tile) step: conv-as-matmul into an f32 accumulator; on the last K step
    emit the bf16 y tile plus per-tile BN partial statistics (sum, sum of squares)."""
    k = pl.program_id(1)

    @pl.when(k == 0)
    def _():
        acc_ref[...] = jnp.zeros_like(acc_ref)

    acc_ref[...] += jnp.dot(p_ref[...], w_ref[...], preferred_element_type=jnp.float32)

    @pl.when(k == pl.num_programs(1) - 1)
    def _():
        y = acc_ref[...]                                      # f32, pre-quantization
        y_ref[...] = y.astype(y_ref.dtype)                    # bf16 writeback
        # Per-tile partial statistics -> the M grid axis stays fully "parallel".
        stats_ref[0:1, :] = jnp.sum(y, axis=0, keepdims=True)
        stats_ref[1:2, :] = jnp.sum(y * y, axis=0, keepdims=True)


def bn_act_nchw_kernel(y_ref, scale_ref, shift_ref, o_ref):
    """Folded BatchNorm affine + LeakyReLU(0.2); stores the tile transposed so the HBM output
    is already channel-major (NCHW) -- no extra XLA transpose pass."""
    yn = y_ref[...].astype(jnp.float32) * scale_ref[...] + shift_ref[...]
    act = jnp.where(yn >= 0, yn, 0.2 * yn)                    # (tm2, C_pad)
    o_ref[...] = act[:, :o_ref.shape[0]].T                    # (Cout, tm2)


def bn_act_kernel(y_ref, scale_ref, shift_ref, o_ref):
    """Fallback (shape-constrained cases): folded BN affine + LeakyReLU in (M, C) layout."""
    yn = y_ref[...].astype(jnp.float32) * scale_ref[...] + shift_ref[...]
    o_ref[...] = jnp.where(yn >= 0, yn, 0.2 * yn)


# ------------------------- wrapper -------------------------

def down_block(x, w, gamma, beta, *, eps=1e-5):
    """x: (N, Cin, H, W) f32.  w: (Cout, Cin, 4, 4) f32.  gamma/beta: (Cout,) f32.  Returns NCHW f32."""
    N, Cin, H, W = x.shape
    Cout = w.shape[0]
    KH = KW = 4
    Ho, Wo = H // 2, W // 2
    HW = Ho * Wo
    M = N * HW
    K = Cin * KH * KW

    # Lane padding only when Cout is already >= 128; padding tiny channel counts to 128 would
    # multiply the y round-trip HBM bytes by 128/Cout (far worse than masked partial stores).
    C_pad = Cout if Cout < 128 else _round_up(Cout, 128)

    # ---- per-generation VMEM budget (v7x: 64 MiB physical, v5e/v6e: 128 MiB) ----
    try:
        vmem_phys = int(pltpu.get_tpu_info().vmem_capacity_bytes)
    except Exception:
        vmem_phys = 64 * 1024 * 1024                      # conservative: assume smallest (v7x)
    tile_budget = int(0.40 * vmem_phys)                   # ~25 MiB v7x, ~51 MiB v5e/v6e
    headroom = 4 * 1024 * 1024

    def _vmem_limit(est):
        return min(int(0.9 * vmem_phys), max(est + headroom, 16 * 1024 * 1024))

    # ---- K blocking: keeps weights + a large M tile inside VMEM even for big Cin*Cout ----
    if _buf_bytes(K, C_pad, 2, 1) <= tile_budget // 3:
        tk, n_k = K, 1                                    # single K block, weights VMEM-resident
    else:
        tk = 4096
        while tk > 128 and _buf_bytes(tk, C_pad, 2, 2) > tile_budget // 3:
            tk //= 2
        n_k = -(-K // tk)
    K_pad = tk * n_k

    # ---- M tile: as large as the budget allows; >= 2 tiles so both v7x TensorCores get work ----
    w_bufs = 1 if n_k == 1 else 2

    def k1_bytes(t):
        return (_buf_bytes(t, tk, 2, 2)                   # bf16 patch tile, double-buffered
                + _buf_bytes(tk, C_pad, 2, w_bufs)        # bf16 weights
                + _buf_bytes(t, C_pad, 2, 2)              # bf16 y tile out
                + _buf_bytes(2, C_pad, 4, 2)              # f32 stats tile out
                + _buf_bytes(t, C_pad, 4, 1))             # f32 accumulator scratch

    tm = 1024
    while tm > 64 and k1_bytes(tm) > tile_budget:
        tm //= 2
    tm = min(tm, _round_up(M, 16))
    tm = min(tm, max(16, _round_up(-(-M // 2), 16)))      # n_m >= 2 (v7x megacore) when possible
    M_pad = _round_up(M, tm)
    n_m = M_pad // tm

    # ---- glue (layout only, bf16): reflect pad + strided patch extraction (im2col) ----
    # TODO(synk): fuse the im2col into kernel 1 (pl.ANY input + per-tile DMA) to kill the 16x
    # patch-matrix HBM round trip; bf16 glue halves it in the meantime.
    x_p = jnp.pad(x, ((0, 0), (0, 0), (1, 1), (1, 1)), mode="reflect").astype(jnp.bfloat16)
    x_nhwc = x_p.transpose(0, 2, 3, 1)                                   # (N, H+2, W+2, Cin)
    cols = []
    for kh in range(KH):
        for kw in range(KW):
            cols.append(x_nhwc[:, kh:kh + 2 * Ho:2, kw:kw + 2 * Wo:2, :])  # (N, Ho, Wo, Cin)
    patches = jnp.stack(cols, axis=3).reshape(M, K)                        # (M, K), (kh,kw,cin)
    patches = jnp.pad(patches, ((0, M_pad - M), (0, K_pad - K)))           # zero rows/cols: safe
    # weights: (Cout, Cin, kh, kw) -> (K, Cout) in matching (kh, kw, cin) order, padded
    w_mat = w.transpose(0, 2, 3, 1).reshape(Cout, K).T.astype(jnp.bfloat16)
    w_mat = jnp.pad(w_mat, ((0, K_pad - K), (0, C_pad - Cout)))

    # ---- kernel 1: conv matmul (K-blocked) + per-tile BN partial statistics ----
    if n_k == 1:
        # Block index would be constant across the grid -> keep one resident copy in VMEM
        # instead of a wasted double buffer.
        w_spec = pl.BlockSpec(memory_space=pltpu.MemorySpace.VMEM)
    else:
        w_spec = pl.BlockSpec((tk, C_pad), lambda i, k: (k, 0))

    y_full, stats_part = pl.pallas_call(
        conv_stats_kernel,
        out_shape=(
            jax.ShapeDtypeStruct((M_pad, C_pad), jnp.bfloat16),
            jax.ShapeDtypeStruct((n_m, 2, C_pad), jnp.float32),
        ),
        grid=(n_m, n_k),
        in_specs=[
            pl.BlockSpec((tm, tk), lambda i, k: (i, k)),
            w_spec,
        ],
        out_specs=(
            pl.BlockSpec((tm, C_pad), lambda i, k: (i, 0)),
            pl.BlockSpec((None, 2, C_pad), lambda i, k: (i, 0, 0)),
        ),
        scratch_shapes=[pltpu.VMEM((tm, C_pad), jnp.float32)],
        compiler_params=pltpu.CompilerParams(
            dimension_semantics=("parallel", "arbitrary"),
            vmem_limit_bytes=_vmem_limit(k1_bytes(tm))),
    )(patches, w_mat)

    # ---- tiny glue: reduce partial stats and fold BN into scale/shift ----
    m = jnp.float32(M)                                    # padded rows contribute exact zeros
    stats = jnp.sum(stats_part, axis=0)                   # (2, C_pad)
    mean = stats[0] / m
    var = jnp.maximum(stats[1] / m - mean * mean, 0.0)    # clamp f32 cancellation
    gamma_p = jnp.pad(gamma.reshape(-1).astype(jnp.float32), (0, C_pad - Cout))
    beta_p = jnp.pad(beta.reshape(-1).astype(jnp.float32), (0, C_pad - Cout))
    scale1 = gamma_p * lax.rsqrt(var + eps)
    shift1 = beta_p - mean * scale1
    scale = scale1.reshape(1, C_pad)
    shift = shift1.reshape(1, C_pad)

    # ---- kernel 2: folded BN + LeakyReLU, own tiling, output written directly as NCHW ----
    def k2_bytes(t):
        return (_buf_bytes(t, C_pad, 2, 2)                # bf16 y in
                + _buf_bytes(Cout, t, 4, 2)               # f32 NCHW out tile
                + 2 * _buf_bytes(1, C_pad, 4, 2))         # scale / shift

    cand = []
    if HW % 16 == 0 and k2_bytes(HW) <= tile_budget:
        cand.append(HW)
    d = 128
    while d <= min(HW, 8192):
        if HW % d == 0 and k2_bytes(d) <= tile_budget:
            cand.append(d)
        d += 128
    tm2 = max(cand) if cand else 0

    if tm2 > 0:
        n_j = HW // tm2
        out_flat = pl.pallas_call(
            bn_act_nchw_kernel,
            out_shape=jax.ShapeDtypeStruct((N, Cout, HW), jnp.float32),
            grid=(N, n_j),
            in_specs=[
                pl.BlockSpec((tm2, C_pad), lambda n, j: (n * n_j + j, 0)),
                pl.BlockSpec((1, C_pad), lambda n, j: (0, 0)),
                pl.BlockSpec((1, C_pad), lambda n, j: (0, 0)),
            ],
            out_specs=pl.BlockSpec((None, Cout, tm2), lambda n, j: (n, 0, j)),
            compiler_params=pltpu.CompilerParams(
                dimension_semantics=("parallel", "parallel"),
                vmem_limit_bytes=_vmem_limit(k2_bytes(tm2))),
        )(y_full, scale, shift)
        return out_flat.reshape(N, Cout, Ho, Wo)          # free metadata reshape

    # Fallback for shapes where Ho*Wo has no lane-aligned tiling: (M, C) pass + XLA transpose.
    def k2f_bytes(t):
        return _buf_bytes(t, C_pad, 2, 2) + _buf_bytes(t, C_pad, 4, 2) + 2 * _buf_bytes(1, C_pad, 4, 2)

    out_full = pl.pallas_call(
        bn_act_kernel,
        out_shape=jax.ShapeDtypeStruct((M_pad, C_pad), jnp.float32),
        grid=(n_m,),
        in_specs=[
            pl.BlockSpec((tm, C_pad), lambda i: (i, 0)),
            pl.BlockSpec((1, C_pad), lambda i: (0, 0)),
            pl.BlockSpec((1, C_pad), lambda i: (0, 0)),
        ],
        out_specs=pl.BlockSpec((tm, C_pad), lambda i: (i, 0)),
        compiler_params=pltpu.CompilerParams(
            dimension_semantics=("parallel",),
            vmem_limit_bytes=_vmem_limit(k2f_bytes(tm))),
    )(y_full, scale, shift)
    return out_full[:M, :Cout].reshape(N, Ho, Wo, Cout).transpose(0, 3, 1, 2)


# ------------------------- pure-JAX reference (for verification) -------------------------

def down_block_ref(x, w, gamma, beta, eps=1e-5):
    x_p = jnp.pad(x, ((0, 0), (0, 0), (1, 1), (1, 1)), mode="reflect")
    y = lax.conv_general_dilated(
        x_p, w, window_strides=(2, 2), padding="VALID",
        dimension_numbers=("NCHW", "OIHW", "NCHW"))
    mean = jnp.mean(y, axis=(0, 2, 3), keepdims=True)
    var = jnp.mean((y - mean) ** 2, axis=(0, 2, 3), keepdims=True)
    g = gamma.reshape(1, -1, 1, 1)
    b = beta.reshape(1, -1, 1, 1)
    yn = (y - mean) * lax.rsqrt(var + eps) * g + b
    return jnp.where(yn >= 0, yn, 0.2 * yn)


# ------------------------- main -------------------------

if __name__ == "__main__":
    key = jax.random.PRNGKey(0)
    N, Cin, H, W = 2, 4, 16, 16
    Cout = 8

    kx, kw, kg, kb = jax.random.split(key, 4)
    x = jax.random.normal(kx, (N, Cin, H, W), dtype=jnp.float32)
    w = 0.1 * jax.random.normal(kw, (Cout, Cin, 4, 4), dtype=jnp.float32)
    gamma = 1.0 + 0.05 * jax.random.normal(kg, (Cout,), dtype=jnp.float32)
    beta = 0.05 * jax.random.normal(kb, (Cout,), dtype=jnp.float32)

    out = jax.jit(down_block)(x, w, gamma, beta)
    out = jax.block_until_ready(out)

    ref = down_block_ref(x, w, gamma, beta)
    assert out.shape == (N, Cout, H // 2, W // 2)
    # bf16 MXU operands + bf16 y storage -> compare against the f32 reference at bf16 tolerance
    max_err = float(jnp.max(jnp.abs(out - ref)))
    assert jnp.allclose(out, ref, atol=5e-2, rtol=5e-2), max_err

    print("KERNEL_OK")
</pallas_src>

<mosaic_0001>
module attributes {stable_mosaic.version = 11 : i64} {
  func.func @conv_stats_kernel(%arg0: i32, %arg1: i32, %arg2: memref<64x64xbf16, #tpu.memory_space<vmem>>, %arg3: memref<64x8xbf16, #tpu.memory_space<vmem>>, %arg4: memref<64x8xbf16, #tpu.memory_space<vmem>>, %arg5: memref<1x2x8xf32, #tpu.memory_space<vmem>>, %arg6: memref<64x8xf32, #tpu.memory_space<vmem>>) attributes {dimension_semantics = [#tpu.dimension_semantics<parallel>, #tpu.dimension_semantics<arbitrary>], iteration_bounds = array<i64: 2, 1>, scalar_prefetch = 0 : i64, scratch_operands = 1 : i64, tpu.core_type = #tpu.core_type<tc>, window_params = [{transform_indices = @transform_0, window_bounds = array<i64: 64, 64>}, {pipeline_mode = #tpu.pipeline_mode<synchronous>, transform_indices = @transform_1, window_bounds = array<i64: 64, 8>}, {transform_indices = @transform_2, window_bounds = array<i64: 64, 8>}, {transform_indices = @transform_3, window_bounds = array<i64: 1, 2, 8>}]} {
    %c0_i32 = arith.constant 0 : i32
    %0 = arith.cmpi eq, %arg1, %c0_i32 : i32
    %1 = arith.extui %0 : i1 to i32
    %c0_i32_0 = arith.constant 0 : i32
    %2 = arith.cmpi ne, %1, %c0_i32_0 : i32
    scf.if %2 {
      %cst_10 = arith.constant 0.000000e+00 : f32
      %12 = vector.broadcast %cst_10 : f32 to vector<64x8xf32>
      %c0_11 = arith.constant 0 : index
      %c0_12 = arith.constant 0 : index
      %13 = vector.load %arg6[%c0_11, %c0_12] : memref<64x8xf32, #tpu.memory_space<vmem>>, vector<64x8xf32>
      tpu.vector_store %arg6[%c0_11, %c0_12], %12 {strides = array<i32>} : memref<64x8xf32, #tpu.memory_space<vmem>>, vector<64x8xf32>,
    } else {
    }
    %c0 = arith.constant 0 : index
    %c0_1 = arith.constant 0 : index
    %3 = vector.load %arg6[%c0, %c0_1] : memref<64x8xf32, #tpu.memory_space<vmem>>, vector<64x8xf32>
    %c0_2 = arith.constant 0 : index
    %c0_3 = arith.constant 0 : index
    %4 = vector.load %arg2[%c0_2, %c0_3] : memref<64x64xbf16, #tpu.memory_space<vmem>>, vector<64x64xbf16>
    %c0_4 = arith.constant 0 : index
    %c0_5 = arith.constant 0 : index
    %5 = vector.load %arg3[%c0_4, %c0_5] : memref<64x8xbf16, #tpu.memory_space<vmem>>, vector<64x8xbf16>
    %cst = arith.constant dense<0.000000e+00> : vector<64x8xf32>
    %6 = tpu.matmul %4, %5, %cst {dimension_numbers = #tpu.dot_dimension_numbers<[1], [0], [0], [1], [0, 0, 1, 1], [], []>} : vector<64x64xbf16>, vector<64x8xbf16>, vector<64x8xf32> -> vector<64x8xf32>
    %7 = arith.addf %3, %6 : vector<64x8xf32>
    %c0_6 = arith.constant 0 : index
    %c0_7 = arith.constant 0 : index
    %8 = vector.load %arg6[%c0_6, %c0_7] : memref<64x8xf32, #tpu.memory_space<vmem>>, vector<64x8xf32>
    tpu.vector_store %arg6[%c0_6, %c0_7], %7 {strides = array<i32>} : memref<64x8xf32, #tpu.memory_space<vmem>>, vector<64x8xf32>,
    %c0_i32_8 = arith.constant 0 : i32
    %9 = arith.cmpi eq, %arg1, %c0_i32_8 : i32
    %10 = arith.extui %9 : i1 to i32
    %c0_i32_9 = arith.constant 0 : i32
    %11 = arith.cmpi ne, %10, %c0_i32_9 : i32
    scf.if %11 {
      %c0_10 = arith.constant 0 : index
      %c0_11 = arith.constant 0 : index
      %12 = vector.load %arg6[%c0_10, %c0_11] : memref<64x8xf32, #tpu.memory_space<vmem>>, vector<64x8xf32>
      %13 = arith.truncf %12 : vector<64x8xf32> to vector<64x8xbf16>
      %c0_12 = arith.constant 0 : index
      %c0_13 = arith.constant 0 : index
      %14 = vector.load %arg4[%c0_12, %c0_13] : memref<64x8xbf16, #tpu.memory_space<vmem>>, vector<64x8xbf16>
      tpu.vector_store %arg4[%c0_12, %c0_13], %13 {strides = array<i32>} : memref<64x8xbf16, #tpu.memory_space<vmem>>, vector<64x8xbf16>,
      %cst_14 = arith.constant dense<0.000000e+00> : vector<8xf32>
      %15 = vector.multi_reduction <add>, %12, %cst_14 [0] : vector<64x8xf32> to vector<8xf32>
      %16 = vector.shape_cast %15 : vector<8xf32> to vector<1x8xf32>
      %c0_15 = arith.constant 0 : index
      %c0_16 = arith.constant 0 : index
      %c0_17 = arith.constant 0 : index
      %17 = vector.load %arg5[%c0_15, %c0_16, %c0_17] : memref<1x2x8xf32, #tpu.memory_space<vmem>>, vector<1x1x8xf32>
      %18 = vector.shape_cast %17 : vector<1x1x8xf32> to vector<1x8xf32>
      %19 = vector.shape_cast %16 : vector<1x8xf32> to vector<1x1x8xf32>
      tpu.vector_store %arg5[%c0_15, %c0_16, %c0_17], %19 {strides = array<i32>} : memref<1x2x8xf32, #tpu.memory_space<vmem>>, vector<1x1x8xf32>,
      %20 = arith.mulf %12, %12 : vector<64x8xf32>
      %cst_18 = arith.constant dense<0.000000e+00> : vector<8xf32>
      %21 = vector.multi_reduction <add>, %20, %cst_18 [0] : vector<64x8xf32> to vector<8xf32>
      %22 = vector.shape_cast %21 : vector<8xf32> to vector<1x8xf32>
      %c0_19 = arith.constant 0 : index
      %c1 = arith.constant 1 : index
      %c0_20 = arith.constant 0 : index
      %23 = vector.load %arg5[%c0_19, %c1, %c0_20] : memref<1x2x8xf32, #tpu.memory_space<vmem>>, vector<1x1x8xf32>
      %24 = vector.shape_cast %23 : vector<1x1x8xf32> to vector<1x8xf32>
      %25 = vector.shape_cast %22 : vector<1x8xf32> to vector<1x1x8xf32>
      tpu.vector_store %arg5[%c0_19, %c1, %c0_20], %25 {strides = array<i32>} : memref<1x2x8xf32, #tpu.memory_space<vmem>>, vector<1x1x8xf32>,
    } else {
    }
    return
  }
  func.func @transform_0(%arg0: i32, %arg1: i32) -> (i32, i32) {
    %c0_i32 = arith.constant 0 : i32
    return %arg0, %arg1 : i32, i32
  }
  func.func @transform_1(%arg0: i32, %arg1: i32) -> (i32, i32) {
    %c0_i32 = arith.constant 0 : i32
    %c0_i32_0 = arith.constant 0 : i32
    %c0_i32_1 = arith.constant 0 : i32
    return %c0_i32, %c0_i32_0 : i32, i32
  }
  func.func @transform_2(%arg0: i32, %arg1: i32) -> (i32, i32) {
    %c0_i32 = arith.constant 0 : i32
    %c0_i32_0 = arith.constant 0 : i32
    return %arg0, %c0_i32 : i32, i32
  }
  func.func @transform_3(%arg0: i32, %arg1: i32) -> (i32, i32, i32) {
    %c0_i32 = arith.constant 0 : i32
    %c0_i32_0 = arith.constant 0 : i32
    %c0_i32_1 = arith.constant 0 : i32
    return %arg0, %c0_i32, %c0_i32_0 : i32, i32, i32
  }
}

module attributes {stable_mosaic.version = 11 : i64} {
  func.func @bn_act_nchw_kernel(%arg0: i32, %arg1: i32, %arg2: memref<64x8xbf16, #tpu.memory_space<vmem>>, %arg3: memref<1x8xf32, #tpu.memory_space<vmem>>, %arg4: memref<1x8xf32, #tpu.memory_space<vmem>>, %arg5: memref<1x8x64xf32, #tpu.memory_space<vmem>>) attributes {dimension_semantics = [#tpu.dimension_semantics<parallel>, #tpu.dimension_semantics<parallel>], iteration_bounds = array<i64: 2, 1>, scalar_prefetch = 0 : i64, scratch_operands = 0 : i64, tpu.core_type = #tpu.core_type<tc>, window_params = [{transform_indices = @transform_0, window_bounds = array<i64: 64, 8>}, {pipeline_mode = #tpu.pipeline_mode<synchronous>, transform_indices = @transform_1, window_bounds = array<i64: 1, 8>}, {pipeline_mode = #tpu.pipeline_mode<synchronous>, transform_indices = @transform_2, window_bounds = array<i64: 1, 8>}, {transform_indices = @transform_3, window_bounds = array<i64: 1, 8, 64>}]} {
    %c0 = arith.constant 0 : index
    %c0_0 = arith.constant 0 : index
    %0 = vector.load %arg2[%c0, %c0_0] : memref<64x8xbf16, #tpu.memory_space<vmem>>, vector<64x8xbf16>
    %1 = arith.extf %0 : vector<64x8xbf16> to vector<64x8xf32>
    %c0_1 = arith.constant 0 : index
    %c0_2 = arith.constant 0 : index
    %2 = vector.load %arg3[%c0_1, %c0_2] : memref<1x8xf32, #tpu.memory_space<vmem>>, vector<1x8xf32>
    %3 = vector.broadcast %2 : vector<1x8xf32> to vector<64x8xf32>
    %4 = arith.mulf %1, %3 : vector<64x8xf32>
    %c0_3 = arith.constant 0 : index
    %c0_4 = arith.constant 0 : index
    %5 = vector.load %arg4[%c0_3, %c0_4] : memref<1x8xf32, #tpu.memory_space<vmem>>, vector<1x8xf32>
    %6 = vector.broadcast %5 : vector<1x8xf32> to vector<64x8xf32>
    %7 = arith.addf %4, %6 : vector<64x8xf32>
    %cst = arith.constant 0.000000e+00 : f32
    %8 = vector.broadcast %cst : f32 to vector<64x8xf32>
    %9 = arith.cmpf oge, %7, %8 : vector<64x8xf32>
    %cst_5 = arith.constant 2.000000e-01 : f32
    %10 = vector.broadcast %cst_5 : f32 to vector<64x8xf32>
    %11 = arith.mulf %10, %7 : vector<64x8xf32>
    %12 = arith.select %9, %7, %11 : vector<64x8xi1>, vector<64x8xf32>
    %13 = tpu.transpose %12, [1, 0] : vector<64x8xf32> -> vector<8x64xf32>
    %c0_6 = arith.constant 0 : index
    %c0_7 = arith.constant 0 : index
    %c0_8 = arith.constant 0 : index
    %14 = vector.load %arg5[%c0_6, %c0_7, %c0_8] : memref<1x8x64xf32, #tpu.memory_space<vmem>>, vector<1x8x64xf32>
    %15 = vector.shape_cast %14 : vector<1x8x64xf32> to vector<8x64xf32>
    %16 = vector.shape_cast %13 : vector<8x64xf32> to vector<1x8x64xf32>
    tpu.vector_store %arg5[%c0_6, %c0_7, %c0_8], %16 {strides = array<i32>} : memref<1x8x64xf32, #tpu.memory_space<vmem>>, vector<1x8x64xf32>,
    return
  }
  func.func @transform_0(%arg0: i32, %arg1: i32) -> (i32, i32) {
    %c1_i32 = arith.constant 1 : i32
    %0 = arith.muli %arg0, %c1_i32 : i32
    %1 = arith.addi %0, %arg1 : i32
    %c0_i32 = arith.constant 0 : i32
    %c0_i32_0 = arith.constant 0 : i32
    return %1, %c0_i32 : i32, i32
  }
  func.func @transform_1(%arg0: i32, %arg1: i32) -> (i32, i32) {
    %c0_i32 = arith.constant 0 : i32
    %c0_i32_0 = arith.constant 0 : i32
    %c0_i32_1 = arith.constant 0 : i32
    return %c0_i32, %c0_i32_0 : i32, i32
  }
  func.func @transform_2(%arg0: i32, %arg1: i32) -> (i32, i32) {
    %c0_i32 = arith.constant 0 : i32
    %c0_i32_0 = arith.constant 0 : i32
    %c0_i32_1 = arith.constant 0 : i32
    return %c0_i32, %c0_i32_0 : i32, i32
  }
  func.func @transform_3(%arg0: i32, %arg1: i32) -> (i32, i32, i32) {
    %c0_i32 = arith.constant 0 : i32
    %c0_i32_0 = arith.constant 0 : i32
    return %arg0, %c0_i32, %arg1 : i32, i32, i32
  }
}

</mosaic_0001>

<bundles_post_ra>
// kernel: down_block.3
= control target key start
LH: loop header
LB: loop body
LE: loop exit
PB: predicated region body
PF: predicated region fallthrough
CT: control target
= control target key end

     0   :  { %s473_s12 = smov 0   ;;  %s475_s13 = smov 0   ;;  %s517_s0 = inlined_call_operand.vmem [shape: bf16[128,8], index: 0, kind: input, shape index: {}]   ;;  %s518_s1 = inlined_call_operand.vmem [shape: f32[1,8], index: 1, kind: input, shape index: {}]   ;;  %s519_s2 = inlined_call_operand.vmem [shape: f32[1,8], index: 2, kind: input, shape index: {}]   ;;  %s520_s3 = inlined_call_operand.vmem [shape: f32[2,8,64], index: 3, kind: output, shape index: {}]  }
   0x1   :  { %s477_s14 = smov 0  }
   0x2 LB: > { %s25_s15 = sadd.s32 1, %s447_s13  ;;  %p377_p0 = scmp.ge.s32.totalorder %s451_s14, 1  ;;  %s451_s14 = sphi %s477_s14, %s13_s14   ;;  %s447_s13 = sphi %s475_s13, %s522_s13   ;;  %s443_s12 = sphi %s473_s12, %s521_s12  }
   0x3   : > { %p27_p1 = scmp.ge.s32.totalorder %s25_s15, 2  ;;  %p156_p2 = scmp.lt.s32.totalorder %s451_s14, 3 }
   0x5   : > { %s524_s15 = smov (%p27_p1, %s25_s15), 0  ;;  %p157_p3 = pnand %p377_p0, %p156_p2 }
   0x6   : > { %s378_s16 = sshll.u32 (!%p157_p3), %s443_s12, 3  ;;  %v381_v1 = vld [vmem:[%s518_s1] ss:$0 sm:$0xff] (!%p157_p3)  ;;  %p191_p5 = scmp.lt.s32.totalorder (!%p157_p3), %s443_s12, 1  ;;  %vm300_vm8 = vcmask (!%p157_p3), 523264  }
   0x7   : > { %160 = sbr.rel (%p157_p3) target bundleno = 157 (0x9d), region = 32  ;;  %p185_p4 = scmp.lt.s32.totalorder (!%p157_p3), %s378_s16, 15  ;;  %v382_v6 = vld [vmem:[%s519_s2] ss:$0 sm:$0xff] (!%p157_p3) }
   0xe   : > { %s526_s16 = smov (!%p185_p4, %s378_s16), 15  ;;  %s528_s12 = smov (!%p191_p5, %s443_s12), 1 }
   0xf   : > { %s379_s17 = sshll.u32 %s526_s16, 2  ;;  %s380_s25 = sshll.u32 %s528_s12, 3 }
  0x10   : > { %s188_s20 = scalar_lea.vmem %s517_s0, %s379_s17  ;;  %s197_s28 = scalar_lea.vmem %s520_s3, %s380_s25 }
  0x11   : > { %v386_v0 = vld [vmem:[%s188_s20] sm:$0xff]   ;;  %v401_v2 = vld [vmem:[%s188_s20 + $0x8] sm:$0xff]   ;;  %v402_v11 = vld [vmem:[%s188_s20 + $0x10] sm:$0xff]  }
  0x12   : > { %v387_v3 = vunpack.c.l.bf16 %v386_v0  ;;  %v388_v4 = vunpack.c.h.bf16 %v386_v0  ;;  %v391_v5 = vunpack.c.l.bf16 %v401_v2  ;;  %v392_v7 = vunpack.c.h.bf16 %v401_v2  ;;  %v403_v25 = vld [vmem:[%s188_s20 + $0x18] sm:$0xff]  }
  0x13   : > { %v395_v15 = vunpack.c.l.bf16 %v402_v11  ;;  %v396_v20 = vunpack.c.h.bf16 %v402_v11  ;;  %v399_v26 = vunpack.c.l.bf16 %v403_v25  ;;  %v400_v31 = vunpack.c.h.bf16 %v403_v25 }
  0x14   : > { %v221_v8 = vmul.f32 %v387_v3, %v381_v1  ;;  %v222_v9 = vmul.f32 %v388_v4, %v381_v1  ;;  %v223_v10 = vmul.f32 %v391_v5, %v381_v1  ;;  %v224_v14 = vmul.f32 %v392_v7, %v381_v1 }
  0x15   : > { %v225_v24 = vmul.f32 %v395_v15, %v381_v1  ;;  %v226_v30 = vmul.f32 %v396_v20, %v381_v1  ;;  %v227_v35 = vmul.f32 %v399_v26, %v381_v1  ;;  %v228_v39 = vmul.f32 %v400_v31, %v381_v1 }
  0x16   : > { %v236_v12 = vadd.f32 %v382_v6, %v221_v8  ;;  %v237_v13 = vadd.f32 %v382_v6, %v222_v9  ;;  %v238_v18 = vadd.f32 %v382_v6, %v223_v10  ;;  %v239_v23 = vadd.f32 %v382_v6, %v224_v14 }
  0x17   : > { %v240_v29 = vadd.f32 %v382_v6, %v225_v24  ;;  %v241_v34 = vadd.f32 %v382_v6, %v226_v30  ;;  %v242_v38 = vadd.f32 %v382_v6, %v227_v35  ;;  %v243_v42 = vadd.f32 %v382_v6, %v228_v39 }
  0x18   : > { %vm244_vm0 = vcmp.ge.f32.partialorder %v236_v12, 0.0  ;;  %v252_v16 = vmul.f32 0.2, %v236_v12  ;;  %v253_v17 = vmul.f32 0.2, %v237_v13  ;;  %vm245_vm1 = vcmp.ge.f32.partialorder %v237_v13, 0.0 }
  0x19   : > { %v254_v22 = vmul.f32 0.2, %v238_v18  ;;  %vm246_vm2 = vcmp.ge.f32.partialorder %v238_v18, 0.0  ;;  %v255_v28 = vmul.f32 0.2, %v239_v23  ;;  %vm247_vm3 = vcmp.ge.f32.partialorder %v239_v23, 0.0 }
  0x1a   : > { %v260_v19 = vsel %vm244_vm0, %v236_v12, %v252_v16  ;;  %v261_v21 = vsel %vm245_vm1, %v237_v13, %v253_v17  ;;  %v256_v33 = vmul.f32 0.2, %v240_v29  ;;  %vm248_vm4 = vcmp.ge.f32.partialorder %v240_v29, 0.0 }
  0x1b   : > { %268 = vxpose.xlu0.b32.start [1/8] (short) (narrow) %v260_v19, 8  ;;  %v262_v27 = vsel %vm246_vm2, %v238_v18, %v254_v22  ;;  %v263_v32 = vsel %vm247_vm3, %v239_v23, %v255_v28  ;;  %v257_v37 = vmul.f32 0.2, %v241_v34  ;;  %vm249_vm5 = vcmp.ge.f32.partialorder %v241_v34, 0.0 }
  0x1c   : > { %v264_v36 = vsel %vm248_vm4, %v240_v29, %v256_v33  ;;  %v258_v41 = vmul.f32 0.2, %v242_v38  ;;  %vm250_vm6 = vcmp.ge.f32.partialorder %v242_v38, 0.0  ;;  %v259_v44 = vmul.f32 0.2, %v243_v42 }
  0x1d   : > { %v265_v40 = vsel %vm249_vm5, %v241_v34, %v257_v37  ;;  %vm251_vm7 = vcmp.ge.f32.partialorder %v243_v42, 0.0 }
  0x1e   : > { %v266_v43 = vsel %vm250_vm6, %v242_v38, %v258_v41  ;;  %v267_v45 = vsel %vm251_vm7, %v243_v42, %v259_v44 }
  0x1f   : > { %269 = vxpose.xlu0.b32.cont [2/8] (short) (narrow) %v261_v21, 8 }
  0x23   : > { %270 = vxpose.xlu0.b32.cont [3/8] (short) (narrow) %v262_v27, 8 }
  0x27   : > { %271 = vxpose.xlu0.b32.cont [4/8] (short) (narrow) %v263_v32, 8 }
  0x2b   : > { %272 = vxpose.xlu0.b32.cont [5/8] (short) (narrow) %v264_v36, 8 }
  0x2f   : > { %273 = vxpose.xlu0.b32.cont [6/8] (short) (narrow) %v265_v40, 8 }
  0x33   : > { %274 = vxpose.xlu0.b32.cont [7/8] (short) (narrow) %v266_v43, 8 }
  0x37   : > { %275 = vxpose.xlu0.b32.end [8/8] (short) (narrow) %v267_v45, 8 }
  0x9b   : > { %v284_v46 = vpop.trf.xlu0 }
  0x9c   : > { %301 = vst.msk [vmem:[%s197_s28] sm:$0xff] %vm300_vm8, %v284_v46 }
  0x9d PF: > { %s13_s14 = sadd.s32 1, %s451_s14   ;;  %s521_s12 = smov %s447_s13 }
  0x9e   : > { %p10_p6 = scmp.ge.s32.totalorder %s13_s14, 4   ;;  %s522_s13 = smov %s524_s15 }
  0xa0   :  { %12 = sbr.rel (!%p10_p6) target bundleno = 2 (0x2), region = 62 }

// kernel: down_block.2
= control target key start
LH: loop header
LB: loop body
LE: loop exit
PB: predicated region body
PF: predicated region fallthrough
CT: control target
= control target key end

     0   :  { %s739_s12 = smov 0   ;;  %s741_s13 = smov 0   ;;  %s853_s0 = inlined_call_operand.vmem [shape: bf16[128,64], index: 0, kind: input, shape index: {}]   ;;  %s854_s1 = inlined_call_operand.vmem [shape: bf16[64,8], index: 1, kind: input, shape index: {}]   ;;  %s855_s2 = inlined_call_operand.vmem [shape: bf16[128,8], index: 2, kind: output, shape index: {0}]   ;;  %s856_s3 = inlined_call_operand.vmem [shape: f32[2,2,8], index: 3, kind: output, shape index: {1}]  }
   0x1   :  { %s743_s14 = smov 0  }
   0x2 LB: > { %s26_s15 = sadd.s32 1, %s712_s13  ;;  %p593_p0 = scmp.ge.s32.totalorder %s716_s14, 1  ;;  %s716_s14 = sphi %s743_s14, %s14_s14   ;;  %s712_s13 = sphi %s741_s13, %s858_s13   ;;  %s708_s12 = sphi %s739_s12, %s857_s12  }
   0x3   : > { %p28_p1 = scmp.ge.s32.totalorder %s26_s15, 2  ;;  %p158_p2 = scmp.lt.s32.totalorder %s716_s14, 3 }
   0x5   : > { %s860_s15 = smov (%p28_p1, %s26_s15), 0  ;;  %p159_p3 = pnand %p593_p0, %p158_p2 }
   0x6   : > { %v686_v0 = vld [vmem:[%s854_s1] sm:$0xff] (!%p159_p3)   ;;  %s594_s18 = sshll.u32 (!%p159_p3), %s708_s12, 3  ;;  %v687_v1 = vld [vmem:[%s854_s1 + $0x8] sm:$0xff] (!%p159_p3)   ;;  %v688_v2 = vld [vmem:[%s854_s1 + $0x10] sm:$0xff] (!%p159_p3)   ;;  %vm213_vm0 = vcmask (!%p159_p3), 64512   ;;  %v718_v3 = vmov (!%p159_p3), 0.0  }
   0x7   : > { %162 = sbr.rel (%p159_p3) target bundleno = 278 (0x116), region = 28  ;;  %p190_p4 = scmp.lt.s32.totalorder (!%p159_p3), %s594_s18, 15  ;;  %637 = vmatprep.subr.bf16.mxu0 (!%p159_p3), %v686_v0  ;;  %653 = vmatprep.subr.bf16.mxu1 (!%p159_p3), %v686_v0  ;;  %216 = vst.msk [vmem:[#allocation2 + $0x10] sm:$0xff] (!%p159_p3), %vm213_vm0, %v718_v3  ;;  %214 = vst.msk [vmem:[#allocation2] sm:$0xff] (!%p159_p3), %vm213_vm0, %v718_v3  ;;  %vm290_vm1 = vcmask (!%p159_p3), 523264   ;;  %v689_v5 = vld [vmem:[%s854_s1 + $0x18] sm:$0xff] (!%p159_p3)  }
   0x8   : > { %638 = vmatpush3.bf16.msra.mxu0 (!%p159_p3), %v686_v0  ;;  %657 = vmatpush3.bf16.msra.mxu1 (!%p159_p3), %v686_v0  ;;  %215 = vst.msk [vmem:[#allocation2 + $0x8] sm:$0xff] (!%p159_p3), %vm213_vm0, %v718_v3  ;;  %217 = vst.msk [vmem:[#allocation2 + $0x18] sm:$0xff] (!%p159_p3), %vm213_vm0, %v718_v3  ;;  %vm428_vm2 = vcmask (!%p159_p3), 60416   ;;  %p204_p5 = scmp.lt.s32.totalorder (!%p159_p3), %s708_s12, 1  ;;  %vm458_vm3 = vcmask (!%p159_p3), 57344  }
   0x9   : > { %639 = vmatprep.subr.bf16.mxu0 (!%p159_p3), %v687_v1  ;;  %654 = vmatprep.subr.bf16.mxu1 (!%p159_p3), %v687_v1  ;;  %218 = vst.msk [vmem:[#allocation2 + $0x20] sm:$0xff] (!%p159_p3), %vm213_vm0, %v718_v3  ;;  %219 = vst.msk [vmem:[#allocation2 + $0x28] sm:$0xff] (!%p159_p3), %vm213_vm0, %v718_v3 }
   0xa   : > { %220 = vst.msk [vmem:[#allocation2 + $0x30] sm:$0xff] (!%p159_p3), %vm213_vm0, %v718_v3  ;;  %221 = vst.msk [vmem:[#allocation2 + $0x38] sm:$0xff] (!%p159_p3), %vm213_vm0, %v718_v3 }
   0xc   : > { %640 = vmatpush3.bf16.msra.mxu0 (!%p159_p3), %v687_v1  ;;  %658 = vmatpush3.bf16.msra.mxu1 (!%p159_p3), %v687_v1 }
   0xd   : > { %641 = vmatprep.subr.bf16.mxu0 (!%p159_p3), %v688_v2  ;;  %655 = vmatprep.subr.bf16.mxu1 (!%p159_p3), %v688_v2 }
   0xe   : > { %s862_s18 = smov (!%p190_p4, %s594_s18), 15  ;;  %v224_v9 = vld [vmem:[#allocation2 + $0x10] sm:$0xff]  ;;  %v222_v11 = vld [vmem:[#allocation2] sm:$0xff]  ;;  %s864_s12 = smov (!%p204_p5, %s708_s12), 1 }
   0xf   : > { %s595_s23 = sshll.u32 %s862_s18, 2  ;;  %v225_v14 = vld [vmem:[#allocation2 + $0x18] sm:$0xff]  ;;  %v223_v19 = vld [vmem:[#allocation2 + $0x8] sm:$0xff]  ;;  %s598_s5 = sshll.u32 %s864_s12, 1 }
  0x10   : > { %s196_s26 = scalar_lea.vmem %s853_s0, %s595_s23  ;;  %642 = vmatpush3.bf16.msra.mxu0 %v688_v2  ;;  %659 = vmatpush3.bf16.msra.mxu1 %v688_v2  ;;  %v226_v12 = vld [vmem:[#allocation2 + $0x20] sm:$0xff]  ;;  %v227_v22 = vld [vmem:[#allocation2 + $0x28] sm:$0xff]  ;;  %s805_s4 = scalar_lea.vmem %s855_s2, %s595_s23 }
  0x11   : > { %v690_v4 = vld [vmem:[%s196_s26] sm:$0xff]   ;;  %v692_v6 = vld [vmem:[%s196_s26 + $0x10] sm:$0xff]   ;;  %643 = vmatprep.subr.bf16.mxu0 %v689_v5  ;;  %656 = vmatprep.subr.bf16.mxu1 %v689_v5  ;;  %v691_v7 = vld [vmem:[%s196_s26 + $0x8] sm:$0xff]   ;;  %s207_s8 = scalar_lea.vmem %s856_s3, %s598_s5 }
  0x12   : > { %645 = vmatprep.mubr.msk.bf16.mxu0 %vm290_vm1, %v690_v4  ;;  %649 = vmatprep.mubr.msk.bf16.mxu1 %vm290_vm1, %v692_v6  ;;  %v693_v8 = vld [vmem:[%s196_s26 + $0x18] sm:$0xff]   ;;  %v228_v10 = vld [vmem:[#allocation2 + $0x30] sm:$0xff] }
  0x13   : > { %v229_v16 = vld [vmem:[#allocation2 + $0x38] sm:$0xff] }
  0x14   : > { %644 = vmatpush3.bf16.msra.mxu0 %v689_v5  ;;  %660 = vmatpush3.bf16.msra.mxu1 %v689_v5 }
  0x17   : > { %646 = vmatmul.mubr.msk.bf16.vlgmr.msra.gmra.mrb[0].mxu0 %vm290_vm1, %v691_v7  ;;  %650 = vmatmul.mubr.msk.bf16.vlgmr.msra.gmra.mrb[0].mxu1 %vm290_vm1, %v693_v8 }
  0xea   : > { %v647_v13 = vpop.f32.mrb[0].mxu0  ;;  %v651_v15 = vpop.f32.mrb[0].mxu1 }
  0xeb   : > { %v370_v17 = vadd.f32 %v647_v13, %v224_v9  ;;  %v337_v18 = vpop.f32.mrb[1].mxu0  ;;  %v374_v20 = vadd.f32 %v651_v15, %v228_v10  ;;  %v353_v21 = vpop.f32.mrb[1].mxu1 }
  0xec   : > { %v368_v23 = vadd.f32 %v337_v18, %v222_v11  ;;  %v648_v24 = vpop.f32.mrb[2].mxu0  ;;  %v372_v25 = vadd.f32 %v353_v21, %v226_v12  ;;  %v652_v26 = vpop.f32.mrb[2].mxu1 }
  0xed   : > { %379 = vst.msk [vmem:[#allocation2 + $0x10] sm:$0xff] %vm213_vm0, %v370_v17  ;;  %v371_v27 = vadd.f32 %v648_v24, %v225_v14  ;;  %v340_v28 = vpop.f32.mrb[3].mxu0  ;;  %383 = vst.msk [vmem:[#allocation2 + $0x30] sm:$0xff] %vm213_vm0, %v374_v20  ;;  %v375_v29 = vadd.f32 %v652_v26, %v229_v16  ;;  %v356_v30 = vpop.f32.mrb[3].mxu1 }
  0xee   : > { %377 = vst.msk [vmem:[#allocation2] sm:$0xff] %vm213_vm0, %v368_v23  ;;  %v369_v31 = vadd.f32 %v340_v28, %v223_v19  ;;  %381 = vst.msk [vmem:[#allocation2 + $0x20] sm:$0xff] %vm213_vm0, %v372_v25  ;;  %v373_v32 = vadd.f32 %v356_v30, %v227_v22 }
  0xef   : > { %380 = vst.msk [vmem:[#allocation2 + $0x18] sm:$0xff] %vm213_vm0, %v371_v27  ;;  %384 = vst.msk [vmem:[#allocation2 + $0x38] sm:$0xff] %vm213_vm0, %v375_v29 }
  0xf0   : > { %378 = vst.msk [vmem:[#allocation2 + $0x8] sm:$0xff] %vm213_vm0, %v369_v31  ;;  %382 = vst.msk [vmem:[#allocation2 + $0x28] sm:$0xff] %vm213_vm0, %v373_v32 }
  0xf4   : > { %v390_v33 = vld [vmem:[#allocation2 + $0x10] sm:$0xff] }
  0xf5   : > { %v394_v34 = vld [vmem:[#allocation2 + $0x30] sm:$0xff]  ;;  %v623_v35 = vpack.c.bf16 %v390_v33, %v390_v33  ;;  %v388_v36 = vld [vmem:[#allocation2] sm:$0xff]  ;;  %v462_v42 = vmul.f32 %v390_v33, %v390_v33  ;;  %v440_v50 = vsel %vm213_vm0, %v390_v33, 0.0 }
  0xf6   : > { %v627_v37 = vpack.c.bf16 %v394_v34, %v394_v34  ;;  %v621_v38 = vpack.c.bf16 %v388_v36, %v388_v36  ;;  %v460_v39 = vmul.f32 %v388_v36, %v388_v36  ;;  %v391_v40 = vld [vmem:[#allocation2 + $0x18] sm:$0xff]  ;;  %v392_v41 = vld [vmem:[#allocation2 + $0x20] sm:$0xff]  ;;  %v437_v46 = vsel %vm213_vm0, %v388_v36, 0.0 }
  0xf7   : > { %431 = vst.msk [vmem:[%s805_s4 + $0x8] sm:$0xf] %vm428_vm2, %v623_v35  ;;  %v624_v43 = vpack.c.bf16 %v391_v40, %v391_v40  ;;  %v389_v44 = vld [vmem:[#allocation2 + $0x8] sm:$0xff]  ;;  %v395_v45 = vld [vmem:[#allocation2 + $0x38] sm:$0xff]  ;;  %v463_v51 = vmul.f32 %v391_v40, %v391_v40  ;;  %v625_v53 = vpack.c.bf16 %v392_v41, %v392_v41  ;;  %v464_v57 = vmul.f32 %v392_v41, %v392_v41 }
  0xf8   : > { %435 = vst.msk [vmem:[%s805_s4 + $0x18] sm:$0xf] %vm428_vm2, %v627_v37  ;;  %429 = vst.msk [vmem:[%s805_s4] sm:$0xf] %vm428_vm2, %v621_v38  ;;  %v622_v47 = vpack.c.bf16 %v389_v44, %v389_v44  ;;  %v438_v48 = vsel %vm213_vm0, %v389_v44, 0.0  ;;  %v461_v49 = vmul.f32 %v389_v44, %v389_v44  ;;  %v393_v54 = vld [vmem:[#allocation2 + $0x28] sm:$0xff]  ;;  %v628_v58 = vpack.c.bf16 %v395_v45, %v395_v45 }
  0xf9   : > { %432 = vst.msk [vmem:[%s805_s4 + $0xc] sm:$0xf] %vm428_vm2, %v624_v43  ;;  %v439_v52 = vadd.f32 %v438_v48, %v437_v46  ;;  %v468_v55 = vsel %vm213_vm0, %v460_v39, 0.0  ;;  %433 = vst.msk [vmem:[%s805_s4 + $0x10] sm:$0xf] %vm428_vm2, %v625_v53  ;;  %v471_v61 = vsel %vm213_vm0, %v462_v42, 0.0  ;;  %v626_v0 = vpack.c.bf16 %v393_v54, %v393_v54 }
  0xfa   : > { %430 = vst.msk [vmem:[%s805_s4 + $0x4] sm:$0xf] %vm428_vm2, %v622_v47  ;;  %v469_v56 = vsel %vm213_vm0, %v461_v49, 0.0  ;;  %v442_v62 = vsel %vm213_vm0, %v391_v40, 0.0  ;;  %v444_v63 = vsel %vm213_vm0, %v392_v41, 0.0  ;;  %v473_v3 = vsel %vm213_vm0, %v463_v51, 0.0 }
  0xfb   : > { %v441_v59 = vadd.f32 %v440_v50, %v439_v52  ;;  %v470_v60 = vadd.f32 %v469_v56, %v468_v55  ;;  %436 = vst.msk [vmem:[%s805_s4 + $0x1c] sm:$0xf] %vm428_vm2, %v628_v58  ;;  %v475_v4 = vsel %vm213_vm0, %v464_v57, 0.0  ;;  %434 = vst.msk [vmem:[%s805_s4 + $0x14] sm:$0xf] %vm428_vm2, %v626_v0  ;;  %v465_v5 = vmul.f32 %v393_v54, %v393_v54 }
  0xfc   : > { %v466_v8 = vmul.f32 %v394_v34, %v394_v34  ;;  %v446_v9 = vsel %vm213_vm0, %v393_v54, 0.0  ;;  %v448_v12 = vsel %vm213_vm0, %v394_v34, 0.0  ;;  %v467_v13 = vmul.f32 %v395_v45, %v395_v45 }
  0xfd   : > { %v472_v1 = vadd.f32 %v471_v61, %v470_v60  ;;  %v443_v2 = vadd.f32 %v442_v62, %v441_v59  ;;  %v477_v14 = vsel %vm213_vm0, %v465_v5, 0.0  ;;  %v450_v18 = vsel %vm213_vm0, %v395_v45, 0.0 }
  0xfe   : > { %v479_v17 = vsel %vm213_vm0, %v466_v8, 0.0  ;;  %v481_v21 = vsel %vm213_vm0, %v467_v13, 0.0 }
  0xff   : > { %v445_v6 = vadd.f32 %v444_v63, %v443_v2  ;;  %v474_v7 = vadd.f32 %v473_v3, %v472_v1 }
 0x101   : > { %v476_v10 = vadd.f32 %v475_v4, %v474_v7  ;;  %v447_v11 = vadd.f32 %v446_v9, %v445_v6 }
 0x103   : > { %v449_v15 = vadd.f32 %v448_v12, %v447_v11  ;;  %v478_v16 = vadd.f32 %v477_v14, %v476_v10 }
 0x105   : > { %v451_v19 = vadd.f32 %v450_v18, %v449_v15  ;;  %v480_v20 = vadd.f32 %v479_v17, %v478_v16 }
 0x107   : > { %v452_v22 = vrot.slane %v451_v19, 4  ;;  %v482_v23 = vadd.f32 %v481_v21, %v480_v20 }
 0x109   : > { %v453_v24 = vadd.f32 %v452_v22, %v451_v19  ;;  %v483_v25 = vrot.slane %v482_v23, 4 }
 0x10b   : > { %v454_v26 = vrot.slane %v453_v24, 2  ;;  %v484_v27 = vadd.f32 %v483_v25, %v482_v23 }
 0x10d   : > { %v455_v28 = vadd.f32 %v454_v26, %v453_v24  ;;  %v485_v29 = vrot.slane %v484_v27, 2 }
 0x10f   : > { %v456_v30 = vrot.slane %v455_v28, 1  ;;  %v486_v31 = vadd.f32 %v485_v29, %v484_v27 }
 0x111   : > { %v457_v32 = vadd.f32 %v456_v30, %v455_v28  ;;  %v487_v33 = vrot.slane %v486_v31, 1 }
 0x113   : > { %459 = vst.msk [vmem:[%s207_s8] sm:$0x1] %vm458_vm3, %v457_v32  ;;  %v488_v34 = vadd.f32 %v487_v33, %v486_v31 }
 0x115   : > { %489 = vst.msk [vmem:[%s207_s8 + $0x1] sm:$0x1] %vm458_vm3, %v488_v34 }
 0x116 PF: > { %s14_s14 = sadd.s32 1, %s716_s14   ;;  %s857_s12 = smov %s712_s13 }
 0x117   : > { %p11_p6 = scmp.ge.s32.totalorder %s14_s14, 4   ;;  %s858_s13 = smov %s860_s15 }
 0x119   :  { %13 = sbr.rel (!%p11_p6) target bundleno = 2 (0x2), region = 78 }

</bundles_post_ra>
